<compile_context>
chip_gen: v5e
topology: v5e:2x2
jax: 0.10.0
libtpu: 0.0.40
codegen_flags: <defaults>
</compile_context>

<pallas_src>
import functools

import jax
import jax.numpy as jnp
from jax.experimental import pallas as pl
from jax.experimental.pallas import tpu as pltpu


def _sft_kernel(x0_ref, x1_ref, w0_ref, b0_ref, w1_ref, b1_ref, o_ref):
    """Fused SFT layer on one (batch, pixel-tile) block.

    x0_ref: (out_nc, tn)      feature to be modulated
    x1_ref: (in_nc, tn)       condition features
    w0_ref: (2*nf, in_nc)     fused conv0 weight [scale ; shift]   (compute dtype)
    b0_ref: (2*nf, 1)         fused conv0 bias                      (f32)
    w1_ref: (2*out_nc, 2*nf)  block-diagonal conv1 weight           (compute dtype)
    b1_ref: (2*out_nc, 1)     fused conv1 bias, +1 folded into scale half (f32)
    o_ref : (out_nc, tn)
    """
    out_nc = o_ref.shape[0]

    # conv0 (both branches at once), f32 accumulation -> leaky_relu(0.2)
    h = jnp.dot(w0_ref[...], x1_ref[...],
                preferred_element_type=jnp.float32) + b0_ref[...]      # (2nf, tn)
    h = jnp.where(h >= 0, h, 0.2 * h)

    # conv1 (block-diagonal) -> [scale+1 ; shift]   (bias already holds the +1)
    ss = jnp.dot(w1_ref[...], h.astype(w1_ref.dtype),
                 preferred_element_type=jnp.float32) + b1_ref[...]     # (2*out_nc, tn)
    scale = ss[:out_nc]          # 8-sublane-aligned row slices (views)
    shift = ss[out_nc:]

    o_ref[...] = (x0_ref[...] * scale + shift).astype(o_ref.dtype)


@functools.partial(jax.jit, static_argnames=("tn",))
def sft_layer(x0, x1, params, *, tn=4096):
    """x0: (N, out_nc, H, W), x1: (N, in_nc, H, W)  — NCHW like PyTorch."""
    N, out_nc, H, W = x0.shape
    _, in_nc, _, _ = x1.shape
    nf = params["ws0"].shape[1]
    HW = H * W

    # ---- pack / fuse the 1x1-conv weights once (tiny) --------------------
    f32 = jnp.float32
    cdt = x1.dtype  # MXU operand dtype: bf16 inputs -> bf16 MXU passes
    w0 = jnp.concatenate([params["ws0"].T, params["wt0"].T], axis=0).astype(cdt)
    b0 = jnp.concatenate([params["bs0"], params["bt0"]], axis=1).T.astype(f32)
    z = jnp.zeros((out_nc, nf), f32)
    w1 = jnp.block([[params["ws1"].T, z],
                    [z, params["wt1"].T]]).astype(cdt)                  # (2out_nc, 2nf)
    # fold the "+1" of x0*(scale+1) into the scale-branch bias
    b1 = jnp.concatenate([params["bs1"] + 1.0, params["bt1"]], axis=1).T.astype(f32)

    # ---- NCHW -> (N, C, HW): pure reshape, no transpose ------------------
    x0_f = x0.reshape(N, out_nc, HW)
    x1_f = x1.reshape(N, in_nc, HW)

    # ---- pixel-tile sizing (lane axis) — no HBM pad/crop round-trip ------
    if HW <= tn:
        if N == 1 and HW >= 256:
            # keep both v7x TensorCores busy: two balanced 128-aligned tiles
            tn_eff = 128 * (-(-HW // (128 * 2)))
        else:
            tn_eff = HW                       # single full-extent tile
    else:
        n_t = -(-HW // tn)                    # target number of tiles
        tn_eff = 128 * (-(-HW // (128 * n_t)))  # balanced, 128-aligned
    n_tiles = -(-HW // tn_eff)                # last tile may overhang (safe)

    grid = (N, n_tiles)

    # VMEM budget: double-buffered x0/x1/out tiles + f32 h/ss intermediates.
    per_col = (2 * x0.dtype.itemsize * (out_nc + in_nc + out_nc)
               + 4 * (2 * nf + 2 * out_nc))
    vmem_limit = int(min(max(per_col * tn_eff + (4 << 20), 24 << 20), 48 << 20))

    pix_spec = lambda c: pl.BlockSpec((None, c, tn_eff), lambda n, j: (n, 0, j))
    full_spec = lambda r, c: pl.BlockSpec((r, c), lambda n, j: (0, 0))

    out_flat = pl.pallas_call(
        _sft_kernel,
        out_shape=jax.ShapeDtypeStruct((N, out_nc, HW), x0.dtype),
        grid_spec=pltpu.PrefetchScalarGridSpec(
            num_scalar_prefetch=0,
            grid=grid,
            in_specs=[
                pix_spec(out_nc),                 # x0 tile
                pix_spec(in_nc),                  # x1 tile
                full_spec(2 * nf, in_nc),         # fused conv0 weight
                full_spec(2 * nf, 1),             # fused conv0 bias
                full_spec(2 * out_nc, 2 * nf),    # fused conv1 weight (block diag)
                full_spec(2 * out_nc, 1),         # fused conv1 bias (+1 folded)
            ],
            out_specs=pix_spec(out_nc),
        ),
        compiler_params=pltpu.CompilerParams(
            dimension_semantics=("parallel", "parallel"),
            vmem_limit_bytes=vmem_limit),
    )(x0_f, x1_f, w0, b0, w1, b1)

    return out_flat.reshape(N, out_nc, H, W)


def _reference(x0, x1, params):
    """Plain-JAX reference mirroring the PyTorch forward (f32)."""
    def conv1x1(t, w, b):  # t: (N, Cin, H, W), w: (Cin, Cout), b: (1, Cout)
        y = jnp.einsum("nchw,cd->ndhw", t, w)
        return y + b.reshape(1, -1, 1, 1)

    def lrelu(t):
        return jnp.where(t >= 0, t, 0.2 * t)

    scale = conv1x1(lrelu(conv1x1(x1, params["ws0"], params["bs0"])),
                    params["ws1"], params["bs1"])
    shift = conv1x1(lrelu(conv1x1(x1, params["wt0"], params["bt0"])),
                    params["wt1"], params["bt1"])
    return x0 * (scale + 1.0) + shift


def _init_params(key, in_nc, nf, out_nc):
    ks = jax.random.split(key, 8)
    def w(k, cin, cout):
        bound = 1.0 / jnp.sqrt(cin)
        return jax.random.uniform(k, (cin, cout), jnp.float32, -bound, bound)
    def b(k, cin, cout):
        bound = 1.0 / jnp.sqrt(cin)
        return jax.random.uniform(k, (1, cout), jnp.float32, -bound, bound)
    return {
        "ws0": w(ks[0], in_nc, nf), "bs0": b(ks[1], in_nc, nf),
        "ws1": w(ks[2], nf, out_nc), "bs1": b(ks[3], nf, out_nc),
        "wt0": w(ks[4], in_nc, nf), "bt0": b(ks[5], in_nc, nf),
        "wt1": w(ks[6], nf, out_nc), "bt1": b(ks[7], nf, out_nc),
    }


if __name__ == "__main__":
    in_nc, nf, out_nc = 32, 32, 64
    N, H, W = 2, 16, 16

    key = jax.random.PRNGKey(0)
    k_x0, k_x1, k_p = jax.random.split(key, 3)
    x0 = jax.random.normal(k_x0, (N, out_nc, H, W), jnp.float32)  # x[0]
    x1 = jax.random.normal(k_x1, (N, in_nc, H, W), jnp.float32)   # x[1]
    params = _init_params(k_p, in_nc, nf, out_nc)

    out = sft_layer(x0, x1, params)
    jax.block_until_ready(out)
    ref = _reference(x0, x1, params)
    assert out.shape == (N, out_nc, H, W)
    assert jnp.allclose(out, ref, atol=1e-4, rtol=1e-4)

    # Ragged multi-tile path: HW=400 (not a 128 multiple) with tn=256 forces a
    # partial last block — no padding, no crop, garbage cols never stored.
    H2, W2 = 20, 20
    x0b = jax.random.normal(k_x0, (N, out_nc, H2, W2), jnp.float32)
    x1b = jax.random.normal(k_x1, (N, in_nc, H2, W2), jnp.float32)
    outb = sft_layer(x0b, x1b, params, tn=256)
    jax.block_until_ready(outb)
    assert jnp.allclose(outb, _reference(x0b, x1b, params), atol=1e-4, rtol=1e-4)

    # Balanced-tile path: HW=2304 at tn=2048 -> two 1152-wide tiles, exact fit.
    H3, W3 = 48, 48
    x0c = jax.random.normal(k_x0, (N, out_nc, H3, W3), jnp.float32)
    x1c = jax.random.normal(k_x1, (N, in_nc, H3, W3), jnp.float32)
    outc = sft_layer(x0c, x1c, params, tn=2048)
    jax.block_until_ready(outc)
    assert jnp.allclose(outc, _reference(x0c, x1c, params), atol=1e-4, rtol=1e-4)

    # bf16 I/O path: halves HBM traffic, bf16 MXU operands, f32 accumulation.
    out_bf = sft_layer(x0.astype(jnp.bfloat16), x1.astype(jnp.bfloat16), params)
    jax.block_until_ready(out_bf)
    assert out_bf.dtype == jnp.bfloat16
    assert jnp.allclose(out_bf.astype(jnp.float32), ref, atol=0.2, rtol=0.1)

    print("KERNEL_OK")
</pallas_src>

<mosaic_0001>
module attributes {stable_mosaic.version = 11 : i64} {
  func.func @_sft_kernel(%arg0: i32, %arg1: i32, %arg2: memref<1x64x256xf32, #tpu.memory_space<vmem>>, %arg3: memref<1x32x256xf32, #tpu.memory_space<vmem>>, %arg4: memref<64x32xf32, #tpu.memory_space<vmem>>, %arg5: memref<64x1xf32, #tpu.memory_space<vmem>>, %arg6: memref<128x64xf32, #tpu.memory_space<vmem>>, %arg7: memref<128x1xf32, #tpu.memory_space<vmem>>, %arg8: memref<1x64x256xf32, #tpu.memory_space<vmem>>) attributes {dimension_semantics = [#tpu.dimension_semantics<parallel>, #tpu.dimension_semantics<parallel>], iteration_bounds = array<i64: 2, 1>, scalar_prefetch = 0 : i64, scratch_operands = 0 : i64, tpu.core_type = #tpu.core_type<tc>, window_params = [{transform_indices = @transform_0, window_bounds = array<i64: 1, 64, 256>}, {transform_indices = @transform_1, window_bounds = array<i64: 1, 32, 256>}, {pipeline_mode = #tpu.pipeline_mode<synchronous>, transform_indices = @transform_2, window_bounds = array<i64: 64, 32>}, {pipeline_mode = #tpu.pipeline_mode<synchronous>, transform_indices = @transform_3, window_bounds = array<i64: 64, 1>}, {pipeline_mode = #tpu.pipeline_mode<synchronous>, transform_indices = @transform_4, window_bounds = array<i64: 128, 64>}, {pipeline_mode = #tpu.pipeline_mode<synchronous>, transform_indices = @transform_5, window_bounds = array<i64: 128, 1>}, {transform_indices = @transform_6, window_bounds = array<i64: 1, 64, 256>}]} {
    %c0 = arith.constant 0 : index
    %c0_0 = arith.constant 0 : index
    %0 = vector.load %arg4[%c0, %c0_0] : memref<64x32xf32, #tpu.memory_space<vmem>>, vector<64x32xf32>
    %c0_1 = arith.constant 0 : index
    %c0_2 = arith.constant 0 : index
    %c0_3 = arith.constant 0 : index
    %1 = vector.load %arg3[%c0_1, %c0_2, %c0_3] : memref<1x32x256xf32, #tpu.memory_space<vmem>>, vector<1x32x256xf32>
    %2 = vector.shape_cast %1 : vector<1x32x256xf32> to vector<32x256xf32>
    %cst = arith.constant dense<0.000000e+00> : vector<64x256xf32>
    %3 = tpu.matmul %0, %2, %cst {dimension_numbers = #tpu.dot_dimension_numbers<[1], [0], [0], [1], [0, 0, 1, 1], [], []>} : vector<64x32xf32>, vector<32x256xf32>, vector<64x256xf32> -> vector<64x256xf32>
    %c0_4 = arith.constant 0 : index
    %c0_5 = arith.constant 0 : index
    %4 = vector.load %arg5[%c0_4, %c0_5] : memref<64x1xf32, #tpu.memory_space<vmem>>, vector<64x1xf32>
    %5 = vector.broadcast %4 : vector<64x1xf32> to vector<64x256xf32>
    %6 = arith.addf %3, %5 : vector<64x256xf32>
    %cst_6 = arith.constant 0.000000e+00 : f32
    %7 = vector.broadcast %cst_6 : f32 to vector<64x256xf32>
    %8 = arith.cmpf oge, %6, %7 : vector<64x256xf32>
    %cst_7 = arith.constant 2.000000e-01 : f32
    %9 = vector.broadcast %cst_7 : f32 to vector<64x256xf32>
    %10 = arith.mulf %9, %6 : vector<64x256xf32>
    %11 = arith.select %8, %6, %10 : vector<64x256xi1>, vector<64x256xf32>
    %c0_8 = arith.constant 0 : index
    %c0_9 = arith.constant 0 : index
    %12 = vector.load %arg6[%c0_8, %c0_9] : memref<128x64xf32, #tpu.memory_space<vmem>>, vector<128x64xf32>
    %cst_10 = arith.constant dense<0.000000e+00> : vector<128x256xf32>
    %13 = tpu.matmul %12, %11, %cst_10 {dimension_numbers = #tpu.dot_dimension_numbers<[1], [0], [0], [1], [0, 0, 1, 1], [], []>} : vector<128x64xf32>, vector<64x256xf32>, vector<128x256xf32> -> vector<128x256xf32>
    %c0_11 = arith.constant 0 : index
    %c0_12 = arith.constant 0 : index
    %14 = vector.load %arg7[%c0_11, %c0_12] : memref<128x1xf32, #tpu.memory_space<vmem>>, vector<128x1xf32>
    %15 = vector.broadcast %14 : vector<128x1xf32> to vector<128x256xf32>
    %16 = arith.addf %13, %15 : vector<128x256xf32>
    %17 = vector.extract_strided_slice %16 {offsets = [0, 0], sizes = [64, 256], strides = [1, 1]} : vector<128x256xf32> to vector<64x256xf32>
    %18 = vector.extract_strided_slice %16 {offsets = [64, 0], sizes = [64, 256], strides = [1, 1]} : vector<128x256xf32> to vector<64x256xf32>
    %c0_13 = arith.constant 0 : index
    %c0_14 = arith.constant 0 : index
    %c0_15 = arith.constant 0 : index
    %19 = vector.load %arg2[%c0_13, %c0_14, %c0_15] : memref<1x64x256xf32, #tpu.memory_space<vmem>>, vector<1x64x256xf32>
    %20 = vector.shape_cast %19 : vector<1x64x256xf32> to vector<64x256xf32>
    %21 = arith.mulf %20, %17 : vector<64x256xf32>
    %22 = arith.addf %21, %18 : vector<64x256xf32>
    %c0_16 = arith.constant 0 : index
    %c0_17 = arith.constant 0 : index
    %c0_18 = arith.constant 0 : index
    %23 = vector.load %arg8[%c0_16, %c0_17, %c0_18] : memref<1x64x256xf32, #tpu.memory_space<vmem>>, vector<1x64x256xf32>
    %24 = vector.shape_cast %23 : vector<1x64x256xf32> to vector<64x256xf32>
    %25 = vector.shape_cast %22 : vector<64x256xf32> to vector<1x64x256xf32>
    tpu.vector_store %arg8[%c0_16, %c0_17, %c0_18], %25 {strides = array<i32>} : memref<1x64x256xf32, #tpu.memory_space<vmem>>, vector<1x64x256xf32>,
    return
  }
  func.func @transform_0(%arg0: i32, %arg1: i32) -> (i32, i32, i32) {
    %c0_i32 = arith.constant 0 : i32
    %c0_i32_0 = arith.constant 0 : i32
    return %arg0, %c0_i32, %arg1 : i32, i32, i32
  }
  func.func @transform_1(%arg0: i32, %arg1: i32) -> (i32, i32, i32) {
    %c0_i32 = arith.constant 0 : i32
    %c0_i32_0 = arith.constant 0 : i32
    return %arg0, %c0_i32, %arg1 : i32, i32, i32
  }
  func.func @transform_2(%arg0: i32, %arg1: i32) -> (i32, i32) {
    %c0_i32 = arith.constant 0 : i32
    %c0_i32_0 = arith.constant 0 : i32
    %c0_i32_1 = arith.constant 0 : i32
    return %c0_i32, %c0_i32_0 : i32, i32
  }
  func.func @transform_3(%arg0: i32, %arg1: i32) -> (i32, i32) {
    %c0_i32 = arith.constant 0 : i32
    %c0_i32_0 = arith.constant 0 : i32
    %c0_i32_1 = arith.constant 0 : i32
    return %c0_i32, %c0_i32_0 : i32, i32
  }
  func.func @transform_4(%arg0: i32, %arg1: i32) -> (i32, i32) {
    %c0_i32 = arith.constant 0 : i32
    %c0_i32_0 = arith.constant 0 : i32
    %c0_i32_1 = arith.constant 0 : i32
    return %c0_i32, %c0_i32_0 : i32, i32
  }
  func.func @transform_5(%arg0: i32, %arg1: i32) -> (i32, i32) {
    %c0_i32 = arith.constant 0 : i32
    %c0_i32_0 = arith.constant 0 : i32
    %c0_i32_1 = arith.constant 0 : i32
    return %c0_i32, %c0_i32_0 : i32, i32
  }
  func.func @transform_6(%arg0: i32, %arg1: i32) -> (i32, i32, i32) {
    %c0_i32 = arith.constant 0 : i32
    %c0_i32_0 = arith.constant 0 : i32
    return %arg0, %c0_i32, %arg1 : i32, i32, i32
  }
}

</mosaic_0001>

<bundles_post_ra>
// kernel: sft_layer.1
= control target key start
LH: loop header
LB: loop body
LE: loop exit
PB: predicated region body
PF: predicated region fallthrough
CT: control target
= control target key end

     0   :  { %s1174_s21 = smov 0   ;;  %s1176_s22 = smov 0   ;;  %s1502_s0 = inlined_call_operand.vmem [shape: f32[2,64,256], index: 0, kind: input, shape index: {}]   ;;  %s1503_s1 = inlined_call_operand.vmem [shape: f32[2,32,256], index: 1, kind: input, shape index: {}]   ;;  %s1504_s2 = inlined_call_operand.vmem [shape: f32[64,32], index: 2, kind: input, shape index: {}]   ;;  %s1505_s3 = inlined_call_operand.vmem [shape: f32[64,1], index: 3, kind: input, shape index: {}]   ;;  %s1506_s4 = inlined_call_operand.vmem [shape: f32[128,64], index: 4, kind: input, shape index: {}]   ;;  %s1507_s5 = inlined_call_operand.vmem [shape: f32[128,1], index: 5, kind: input, shape index: {}]   ;;  %s1508_s6 = inlined_call_operand.vmem [shape: f32[2,64,256], index: 6, kind: output, shape index: {}]  }
   0x1   :  { %s1178_s23 = smov 0  }
   0x2 LB: > { %s28_s24 = sadd.s32 1, %s1132_s22  ;;  %p1010_p0 = scmp.ge.s32.totalorder %s1136_s23, 1  ;;  %s1136_s23 = sphi %s1178_s23, %s16_s23   ;;  %s1132_s22 = sphi %s1176_s22, %s1510_s22   ;;  %s1128_s21 = sphi %s1174_s21, %s1509_s21  }
   0x3   : > { %p30_p1 = scmp.ge.s32.totalorder %s28_s24, 2  ;;  %p250_p2 = scmp.lt.s32.totalorder %s1136_s23, 3 }
   0x5   : > { %s1512_s24 = smov (%p30_p1, %s28_s24), 0  ;;  %p251_p3 = pnand %p1010_p0, %p250_p2 }
   0x6   : > { %p298_p4 = scmp.lt.s32.totalorder (!%p251_p3), %s1128_s21, 1 }
   0x7   : > { %254 = sbr.rel (%p251_p3) target bundleno = 453 (0x1c5), region = 44 }
   0xc   : > { %v348_v0 = vld [vmem:[%s1505_s3 + $0x28] sm:$0xff]  ;;  %v350_v1 = vld [vmem:[%s1505_s3 + $0x38] sm:$0xff]  ;;  %v1138_v2 = vmov 0   ;;  %s1514_s21 = smov (!%p298_p4, %s1128_s21), 1  ;;  %v347_v7 = vld [vmem:[%s1505_s3 + $0x20] sm:$0xff]  ;;  %vm391_vm0 = vcmask 261120  }
   0xd   : > { %1112 = vset.pattern.permute.xlu1 %v1138_v2  ;;  %1111 = vset.pattern.permute.xlu0 %v1138_v2  ;;  %s1068_s29 = sshll.u32 %s1514_s21, 6  ;;  %v349_v8 = vld [vmem:[%s1505_s3 + $0x30] sm:$0xff]  ;;  %v327_v13 = vld [vmem:[%s1504_s2] sm:$0xff]  ;;  %v346_v14 = vld [vmem:[%s1505_s3 + $0x18] sm:$0xff]  ;;  %s1067_s25 = sshll.u32 %s1514_s21, 7 }
   0xe   : > { %378 = vperm.xlu1 %1112, %v348_v0   ;;  %388 = vperm.xlu0 %1111, %v350_v1   ;;  %s315_s8 = scalar_lea.vmem %s1503_s1, %s1068_s29  ;;  %v343_v15 = vld [vmem:[%s1505_s3] sm:$0xff]  ;;  %v344_v16 = vld [vmem:[%s1505_s3 + $0x8] sm:$0xff]  ;;  %v345_v18 = vld [vmem:[%s1505_s3 + $0x10] sm:$0xff]  ;;  %s1430_s28 = scalar_lea.vmem %s1502_s0, %s1067_s25 }
   0xf   : > { %1113 = vset.pattern.permute.xlu2 %v1138_v2  ;;  %v341_v3 = vld [vmem:[%s315_s8 + $0x30] sm:$0xff]  ;;  %v342_v4 = vld [vmem:[%s315_s8 + $0x38] sm:$0xff]  ;;  %v339_v5 = vld [vmem:[%s315_s8 + $0x20] sm:$0xff]  ;;  %s1441_s30 = scalar_lea.vmem %s1508_s6, %s1067_s25 }
  0x10   : > { %428 = vmatpush.msra.mxu0 %v341_v3  ;;  %469 = vmatpush.msra.mxu1 %v342_v4  ;;  %v340_v6 = vld [vmem:[%s315_s8 + $0x28] sm:$0xff]  ;;  %v337_v9 = vld [vmem:[%s315_s8 + $0x10] sm:$0xff]  ;;  %v338_v10 = vld [vmem:[%s315_s8 + $0x18] sm:$0xff] }
  0x11   : > { %v335_v11 = vld [vmem:[%s315_s8] sm:$0xff]  ;;  %v336_v12 = vld [vmem:[%s315_s8 + $0x8] sm:$0xff]  ;;  %368 = vperm.xlu2 %1113, %v346_v14   ;;  %v564_v20 = vld [vmem:[%s1507_s5 + $0x10] sm:$0xff] }
  0x12   : > { %429 = vmatpush.msra.mxu0 %v339_v5  ;;  %470 = vmatpush.msra.mxu1 %v340_v6  ;;  %v328_v17 = vld [vmem:[%s1504_s2 + $0x8] sm:$0xff]  ;;  %v329_v21 = vld [vmem:[%s1504_s2 + $0x10] sm:$0xff]  ;;  %v562_v22 = vld [vmem:[%s1507_s5] sm:$0xff] }
  0x13   : > { %v563_v19 = vld [vmem:[%s1507_s5 + $0x8] sm:$0xff]  ;;  %v566_v23 = vld [vmem:[%s1507_s5 + $0x20] sm:$0xff]  ;;  %v330_v25 = vld [vmem:[%s1504_s2 + $0x18] sm:$0xff] }
  0x14   : > { %430 = vmatpush.msra.mxu0 %v337_v9  ;;  %471 = vmatpush.msra.mxu1 %v338_v10  ;;  %v567_v24 = vld [vmem:[%s1507_s5 + $0x28] sm:$0xff]  ;;  %v565_v26 = vld [vmem:[%s1507_s5 + $0x18] sm:$0xff]  ;;  %v570_v28 = vld [vmem:[%s1507_s5 + $0x40] sm:$0xff] }
  0x15   : > { %v569_v27 = vld [vmem:[%s1507_s5 + $0x38] sm:$0xff]  ;;  %v331_v29 = vld [vmem:[%s1504_s2 + $0x20] sm:$0xff]  ;;  %v568_v30 = vld [vmem:[%s1507_s5 + $0x30] sm:$0xff] }
  0x16   : > { %373 = vperm.xlu1 %1112, %v347_v7   ;;  %383 = vperm.xlu0 %1111, %v349_v8   ;;  %v572_v31 = vld [vmem:[%s1507_s5 + $0x50] sm:$0xff]  ;;  %v573_v32 = vld [vmem:[%s1507_s5 + $0x58] sm:$0xff]  ;;  %v332_v33 = vld [vmem:[%s1504_s2 + $0x28] sm:$0xff] }
  0x17   : > { %431 = vmatpush.msra.mxu0 %v335_v11  ;;  %472 = vmatpush.msra.mxu1 %v336_v12  ;;  %v571_v34 = vld [vmem:[%s1507_s5 + $0x48] sm:$0xff]  ;;  %v576_v36 = vld [vmem:[%s1507_s5 + $0x70] sm:$0xff]  ;;  %v574_v38 = vld [vmem:[%s1507_s5 + $0x60] sm:$0xff] }
  0x18   : > { %1017 = vmatmul.msk.f32.vlgmr.msra.gmra.mxu0 %vm391_vm0, %v327_v13  ;;  %1025 = vmatmul.msk.f32.vlgmr.msra.gmra.mxu1 %vm391_vm0, %v327_v13  ;;  %v575_v35 = vld [vmem:[%s1507_s5 + $0x68] sm:$0xff]  ;;  %v333_v37 = vld [vmem:[%s1504_s2 + $0x30] sm:$0xff]  ;;  %v334_v39 = vld [vmem:[%s1504_s2 + $0x38] sm:$0xff] }
  0x19   : > { %363 = vperm.xlu2 %1113, %v345_v18   ;;  %v577_v40 = vld [vmem:[%s1507_s5 + $0x78] sm:$0xff] }
  0x1e   : > { %353 = vperm.xlu1 %1112, %v343_v15   ;;  %358 = vperm.xlu0 %1111, %v344_v16  }
  0x20   : > { %1018 = vmatmul.msk.f32.gmra.mxu0 %vm391_vm0, %v328_v17  ;;  %1026 = vmatmul.msk.f32.gmra.mxu1 %vm391_vm0, %v328_v17 }
  0x21   : > { %580 = vperm.xlu2 %1113, %v562_v22  }
  0x26   : > { %585 = vperm.xlu0 %1111, %v563_v19   ;;  %590 = vperm.xlu1 %1112, %v564_v20  }
  0x28   : > { %1019 = vmatmul.msk.f32.gmra.mxu0 %vm391_vm0, %v329_v21  ;;  %1027 = vmatmul.msk.f32.gmra.mxu1 %vm391_vm0, %v329_v21 }
  0x29   : > { %595 = vperm.xlu2 %1113, %v565_v26  }
  0x2e   : > { %600 = vperm.xlu0 %1111, %v566_v23   ;;  %605 = vperm.xlu1 %1112, %v567_v24  }
  0x30   : > { %1020 = vmatmul.msk.f32.gmra.mxu0 %vm391_vm0, %v330_v25  ;;  %1028 = vmatmul.msk.f32.gmra.mxu1 %vm391_vm0, %v330_v25 }
  0x31   : > { %610 = vperm.xlu2 %1113, %v568_v30  }
  0x36   : > { %615 = vperm.xlu0 %1111, %v569_v27   ;;  %620 = vperm.xlu1 %1112, %v570_v28  }
  0x38   : > { %1021 = vmatmul.msk.f32.gmra.mxu0 %vm391_vm0, %v331_v29  ;;  %1029 = vmatmul.msk.f32.gmra.mxu1 %vm391_vm0, %v331_v29 }
  0x39   : > { %625 = vperm.xlu2 %1113, %v571_v34  }
  0x3e   : > { %630 = vperm.xlu0 %1111, %v572_v31   ;;  %635 = vperm.xlu1 %1112, %v573_v32  }
  0x40   : > { %1022 = vmatmul.msk.f32.gmra.mxu0 %vm391_vm0, %v332_v33  ;;  %1030 = vmatmul.msk.f32.gmra.mxu1 %vm391_vm0, %v332_v33 }
  0x41   : > { %640 = vperm.xlu2 %1113, %v574_v38  }
  0x46   : > { %645 = vperm.xlu0 %1111, %v575_v35   ;;  %650 = vperm.xlu1 %1112, %v576_v36  }
  0x48   : > { %1023 = vmatmul.msk.f32.gmra.mxu0 %vm391_vm0, %v333_v37  ;;  %1031 = vmatmul.msk.f32.gmra.mxu1 %vm391_vm0, %v333_v37 }
  0x49   : > { %655 = vperm.xlu2 %1113, %v577_v40  }
  0x50   : > { %1024 = vmatmul.msk.f32.gmra.mxu0 %vm391_vm0, %v334_v39  ;;  %1032 = vmatmul.msk.f32.gmra.mxu1 %vm391_vm0, %v334_v39 }
  0x6b   : > { %v369_v58 = vpop.permute.xlu2 %368 }
  0x73   : > { %v364_v15 = vpop.permute.xlu2 %363 }
  0x80   : > { %v389_v53 = vpop.permute.xlu0 %388  ;;  %v379_v54 = vpop.permute.xlu1 %378 }
  0x88   : > { %v384_v57 = vpop.permute.xlu0 %383  ;;  %v374_v59 = vpop.permute.xlu1 %373 }
  0x90   : > { %v359_v14 = vpop.permute.xlu0 %358  ;;  %v354_v21 = vpop.permute.xlu1 %353 }
  0x95   : > { %v1310_v41 = vpop.f32.mrf.mxu0  ;;  %v1312_v42 = vpop.f32.mrf.mxu1 }
  0x96   : > { %v434_v31 = vadd.f32 %v1310_v41, %v354_v21  ;;  %v475_v34 = vadd.f32 %v1312_v42, %v354_v21 }
  0x98   : > { %v514_v42 = vmul.f32 0.2, %v434_v31  ;;  %vm498_vm15 = vcmp.ge.f32.partialorder %v434_v31, 0.0  ;;  %vm499_vm0 = vcmp.ge.f32.partialorder %v475_v34, 0.0 }
  0x9d   : > { %v436_v43 = vpop.f32.mrf.mxu0  ;;  %v1314_v44 = vpop.f32.mrf.mxu1 }
  0x9e   : > { %v437_v25 = vadd.f32 %v436_v43, %v359_v14  ;;  %v478_v28 = vadd.f32 %v1314_v44, %v359_v14  ;;  %v515_v44 = vmul.f32 0.2, %v475_v34 }
  0xa0   : > { %v516_v38 = vmul.f32 0.2, %v437_v25  ;;  %vm500_vm13 = vcmp.ge.f32.partialorder %v437_v25, 0.0  ;;  %v517_v40 = vmul.f32 0.2, %v478_v28  ;;  %vm501_vm14 = vcmp.ge.f32.partialorder %v478_v28, 0.0 }
  0xa5   : > { %v439_v45 = vpop.f32.mrf.mxu0  ;;  %v480_v46 = vpop.f32.mrf.mxu1 }
  0xa6   : > { %v440_v18 = vadd.f32 %v439_v45, %v364_v15  ;;  %v481_v22 = vadd.f32 %v480_v46, %v364_v15  ;;  %v532_v45 = vsel %vm500_vm13, %v437_v25, %v516_v38  ;;  %v533_v46 = vsel %vm501_vm14, %v478_v28, %v517_v40  ;;  %v840_v38 = vld [vmem:[%s1430_s28 + $0x18] sm:$0xff] }
  0xa8   : > { %v518_v33 = vmul.f32 0.2, %v440_v18  ;;  %vm502_vm11 = vcmp.ge.f32.partialorder %v440_v18, 0.0  ;;  %v519_v36 = vmul.f32 0.2, %v481_v22  ;;  %vm503_vm12 = vcmp.ge.f32.partialorder %v481_v22, 0.0 }
  0xaa   : > { %v534_v41 = vsel %vm502_vm11, %v440_v18, %v518_v33  ;;  %v535_v43 = vsel %vm503_vm12, %v481_v22, %v519_v36  ;;  %v838_v22 = vld [vmem:[%s1430_s28 + $0x8] sm:$0xff] }
  0xad   : > { %v442_v47 = vpop.f32.mrf.mxu0  ;;  %v483_v48 = vpop.f32.mrf.mxu1 }
  0xae   : > { %v443_v8 = vadd.f32 %v442_v47, %v369_v58  ;;  %v484_v16 = vadd.f32 %v483_v48, %v369_v58  ;;  %v530_v47 = vsel %vm498_vm15, %v434_v31, %v514_v42  ;;  %v546_v48 = vld [vmem:[%s1506_s4] sm:$0xff]  ;;  %v555_v58 = vld [vmem:[%s1506_s4 + $0x48] sm:$0xff] }
  0xb0   : > { %v520_v27 = vmul.f32 0.2, %v443_v8  ;;  %vm504_vm9 = vcmp.ge.f32.partialorder %v443_v8, 0.0  ;;  %v521_v30 = vmul.f32 0.2, %v484_v16  ;;  %vm505_vm10 = vcmp.ge.f32.partialorder %v484_v16, 0.0 }
  0xb2   : > { %v536_v37 = vsel %vm504_vm9, %v443_v8, %v520_v27  ;;  %v537_v39 = vsel %vm505_vm10, %v484_v16, %v521_v30 }
  0xb5   : > { %v445_v49 = vpop.f32.mrf.mxu0  ;;  %v486_v50 = vpop.f32.mrf.mxu1 }
  0xb6   : > { %v446_v3 = vadd.f32 %v445_v49, %v374_v59  ;;  %v487_v9 = vadd.f32 %v486_v50, %v374_v59  ;;  %v550_v49 = vld [vmem:[%s1506_s4 + $0x20] sm:$0xff]  ;;  %v531_v50 = vsel %vm499_vm0, %v475_v34, %v515_v44  ;;  %v556_v59 = vld [vmem:[%s1506_s4 + $0x50] sm:$0xff] }
  0xb8   : > { %v522_v20 = vmul.f32 0.2, %v446_v3  ;;  %vm506_vm7 = vcmp.ge.f32.partialorder %v446_v3, 0.0  ;;  %v523_v24 = vmul.f32 0.2, %v487_v9  ;;  %vm507_vm8 = vcmp.ge.f32.partialorder %v487_v9, 0.0 }
  0xba   : > { %v538_v32 = vsel %vm506_vm7, %v446_v3, %v522_v20  ;;  %v539_v35 = vsel %vm507_vm8, %v487_v9, %v523_v24  ;;  %v586_v9 = vpop.permute.xlu0 %585 }
  0xbd   : > { %v448_v51 = vpop.f32.mrf.mxu0  ;;  %v489_v52 = vpop.f32.mrf.mxu1 }
  0xbe   : > { %v449_v0 = vadd.f32 %v448_v51, %v379_v54  ;;  %v490_v4 = vadd.f32 %v489_v52, %v379_v54  ;;  %v547_v51 = vld [vmem:[%s1506_s4 + $0x8] sm:$0xff]  ;;  %v552_v54 = vld [vmem:[%s1506_s4 + $0x30] sm:$0xff] }
  0xbf   : > { %v551_v52 = vld [vmem:[%s1506_s4 + $0x28] sm:$0xff] }
  0xc0   : > { %v524_v13 = vmul.f32 0.2, %v449_v0  ;;  %vm508_vm5 = vcmp.ge.f32.partialorder %v449_v0, 0.0  ;;  %v525_v17 = vmul.f32 0.2, %v490_v4  ;;  %vm509_vm6 = vcmp.ge.f32.partialorder %v490_v4, 0.0 }
  0xc2   : > { %v540_v26 = vsel %vm508_vm5, %v449_v0, %v524_v13  ;;  %v541_v29 = vsel %vm509_vm6, %v490_v4, %v525_v17  ;;  %v561_v0 = vld [vmem:[%s1506_s4 + $0x78] sm:$0xff]  ;;  %v581_v4 = vpop.permute.xlu2 %580  ;;  %v1432_v16 = vpop.permute.xlu0 %600 }
  0xc5   : > { %v451_v55 = vpop.f32.mrf.mxu0  ;;  %v492_v56 = vpop.f32.mrf.mxu1 }
  0xc6   : > { %v452_v60 = vadd.f32 %v451_v55, %v384_v57  ;;  %v493_v61 = vadd.f32 %v492_v56, %v384_v57  ;;  %v549_v55 = vld [vmem:[%s1506_s4 + $0x18] sm:$0xff]  ;;  %v554_v57 = vld [vmem:[%s1506_s4 + $0x40] sm:$0xff] }
  0xc7   : > { %v553_v56 = vld [vmem:[%s1506_s4 + $0x38] sm:$0xff] }
  0xc8   : > { %v526_v5 = vmul.f32 0.2, %v452_v60  ;;  %vm510_vm3 = vcmp.ge.f32.partialorder %v452_v60, 0.0  ;;  %v527_v10 = vmul.f32 0.2, %v493_v61  ;;  %vm511_vm4 = vcmp.ge.f32.partialorder %v493_v61, 0.0 }
  0xca   : > { %v542_v19 = vsel %vm510_vm3, %v452_v60, %v526_v5  ;;  %v543_v23 = vsel %vm511_vm4, %v493_v61, %v527_v10  ;;  %v557_v60 = vld [vmem:[%s1506_s4 + $0x58] sm:$0xff]  ;;  %v558_v61 = vld [vmem:[%s1506_s4 + $0x60] sm:$0xff]  ;;  %v1418_v10 = vpop.permute.xlu2 %595  ;;  %v1444_v34 = vpop.permute.xlu0 %615 }
  0xcd   : > { %v454_v62 = vpop.f32.mrf.mxu0  ;;  %v495_v63 = vpop.f32.mrf.mxu1 }
  0xce   : > { %v455_v1 = vadd.f32 %v454_v62, %v389_v53  ;;  %v496_v2 = vadd.f32 %v495_v63, %v389_v53  ;;  %v548_v53 = vld [vmem:[%s1506_s4 + $0x10] sm:$0xff]  ;;  %v559_v62 = vld [vmem:[%s1506_s4 + $0x68] sm:$0xff] }
  0xcf   : > { %v560_v63 = vld [vmem:[%s1506_s4 + $0x70] sm:$0xff] }
  0xd0   : > { %vm512_vm1 = vcmp.ge.f32.partialorder %v455_v1, 0.0  ;;  %v528_v6 = vmul.f32 0.2, %v455_v1  ;;  %vm513_vm2 = vcmp.ge.f32.partialorder %v496_v2, 0.0  ;;  %v529_v7 = vmul.f32 0.2, %v496_v2 }
  0xd2   : > { %v544_v11 = vsel %vm512_vm1, %v455_v1, %v528_v6  ;;  %v545_v12 = vsel %vm513_vm2, %v496_v2, %v529_v7  ;;  %vm658_vm1 = vcmask 523264   ;;  %v591_v6 = vpop.permute.xlu1 %590  ;;  %v1434_v17 = vpop.permute.xlu2 %610 }
  0xd3   : > { %715 = vmatpush.msrb.mxu0 %v544_v11  ;;  %1070 = vmatpush.msra.mxu2 %v544_v11 }
  0xd4   : > { %780 = vmatpush.msrb.mxu1 %v545_v12  ;;  %1078 = vmatpush.msra.mxu3 %v545_v12 }
  0xd5   : > { %716 = vmatpush.msrb.mxu0 %v542_v19  ;;  %1071 = vmatpush.msra.mxu2 %v542_v19  ;;  %v837_v19 = vld [vmem:[%s1430_s28] sm:$0xff] }
  0xd6   : > { %781 = vmatpush.msrb.mxu1 %v543_v23  ;;  %1079 = vmatpush.msra.mxu3 %v543_v23 }
  0xd7   : > { %717 = vmatpush.msrb.mxu0 %v540_v26  ;;  %1072 = vmatpush.msra.mxu2 %v540_v26 }
  0xd8   : > { %782 = vmatpush.msrb.mxu1 %v541_v29  ;;  %1080 = vmatpush.msra.mxu3 %v541_v29 }
  0xd9   : > { %718 = vmatpush.msrb.mxu0 %v538_v32  ;;  %1073 = vmatpush.msra.mxu2 %v538_v32 }
  0xda   : > { %783 = vmatpush.msrb.mxu1 %v539_v35  ;;  %1081 = vmatpush.msra.mxu3 %v539_v35  ;;  %v1420_v13 = vpop.permute.xlu1 %605  ;;  %v839_v35 = vld [vmem:[%s1430_s28 + $0x10] sm:$0xff] }
  0xdb   : > { %719 = vmatpush.msrb.mxu0 %v536_v37  ;;  %1074 = vmatpush.msra.mxu2 %v536_v37  ;;  %v626_v37 = vpop.permute.xlu2 %625 }
  0xdc   : > { %784 = vmatpush.msrb.mxu1 %v537_v39  ;;  %1082 = vmatpush.msra.mxu3 %v537_v39 }
  0xdd   : > { %720 = vmatpush.msrb.mxu0 %v534_v41  ;;  %1075 = vmatpush.msra.mxu2 %v534_v41 }
  0xde   : > { %785 = vmatpush.msrb.mxu1 %v535_v43  ;;  %1083 = vmatpush.msra.mxu3 %v535_v43 }
  0xdf   : > { %721 = vmatpush.msrb.mxu0 %v532_v45  ;;  %1076 = vmatpush.msra.mxu2 %v532_v45 }
  0xe0   : > { %786 = vmatpush.msrb.mxu1 %v533_v46  ;;  %1084 = vmatpush.msra.mxu3 %v533_v46 }
  0xe1   : > { %722 = vmatpush.msrb.mxu0 %v530_v47  ;;  %1077 = vmatpush.msra.mxu2 %v530_v47 }
  0xe2   : > { %787 = vmatpush.msrb.mxu1 %v531_v50  ;;  %1085 = vmatpush.msra.mxu3 %v531_v50  ;;  %v621_v24 = vpop.permute.xlu1 %620  ;;  %v841_v50 = vld [vmem:[%s1430_s28 + $0x20] sm:$0xff] }
  0xe3   : > { %1033 = vmatmul.msk.f32.vlgmr.msrb.gmra.mxu0 %vm658_vm1, %v546_v48  ;;  %1037 = vmatmul.msk.f32.vlgmr.msra.gmra.mxu2 %vm658_vm1, %v550_v49 }
  0xe4   : > { %1049 = vmatmul.msk.f32.vlgmr.msrb.gmra.mxu1 %vm658_vm1, %v546_v48  ;;  %1053 = vmatmul.msk.f32.vlgmr.msra.gmra.mxu3 %vm658_vm1, %v550_v49 }
  0xeb   : > { %1034 = vmatmul.msk.f32.gmra.mxu0 %vm658_vm1, %v547_v51  ;;  %1038 = vmatmul.msk.f32.gmra.mxu2 %vm658_vm1, %v551_v52 }
  0xec   : > { %1050 = vmatmul.msk.f32.gmra.mxu1 %vm658_vm1, %v547_v51  ;;  %1054 = vmatmul.msk.f32.gmra.mxu3 %vm658_vm1, %v551_v52  ;;  %v842_v52 = vld [vmem:[%s1430_s28 + $0x28] sm:$0xff] }
  0xf3   : > { %1035 = vmatmul.msk.f32.gmra.mxu0 %vm658_vm1, %v548_v53  ;;  %1039 = vmatmul.msk.f32.gmra.mxu2 %vm658_vm1, %v552_v54 }
  0xf4   : > { %1051 = vmatmul.msk.f32.gmra.mxu1 %vm658_vm1, %v548_v53  ;;  %1055 = vmatmul.msk.f32.gmra.mxu3 %vm658_vm1, %v552_v54  ;;  %v631_v53 = vpop.permute.xlu0 %630 }
  0xfb   : > { %1036 = vmatmul.msk.f32.gmra.mxu0 %vm658_vm1, %v549_v55  ;;  %1040 = vmatmul.msk.f32.gmra.mxu2 %vm658_vm1, %v553_v56 }
  0xfc   : > { %1052 = vmatmul.msk.f32.gmra.mxu1 %vm658_vm1, %v549_v55  ;;  %1056 = vmatmul.msk.f32.gmra.mxu3 %vm658_vm1, %v553_v56 }
 0x103   : > { %1041 = vmatmul.msk.f32.gmra.mxu2 %vm658_vm1, %v554_v57 }
 0x104   : > { %1057 = vmatmul.msk.f32.gmra.mxu3 %vm658_vm1, %v554_v57 }
 0x10b   : > { %1042 = vmatmul.msk.f32.gmra.mxu2 %vm658_vm1, %v555_v58 }
 0x10c   : > { %1058 = vmatmul.msk.f32.gmra.mxu3 %vm658_vm1, %v555_v58 }
 0x113   : > { %1043 = vmatmul.msk.f32.gmra.mxu2 %vm658_vm1, %v556_v59 }
 0x114   : > { %1059 = vmatmul.msk.f32.gmra.mxu3 %vm658_vm1, %v556_v59 }
 0x11b   : > { %1044 = vmatmul.msk.f32.gmra.mxu2 %vm658_vm1, %v557_v60 }
 0x11c   : > { %1060 = vmatmul.msk.f32.gmra.mxu3 %vm658_vm1, %v557_v60 }
 0x123   : > { %1045 = vmatmul.msk.f32.gmra.mxu2 %vm658_vm1, %v558_v61 }
 0x124   : > { %1061 = vmatmul.msk.f32.gmra.mxu3 %vm658_vm1, %v558_v61 }
 0x12b   : > { %1046 = vmatmul.msk.f32.gmra.mxu2 %vm658_vm1, %v559_v62 }
 0x12c   : > { %1062 = vmatmul.msk.f32.gmra.mxu3 %vm658_vm1, %v559_v62 }
 0x133   : > { %1047 = vmatmul.msk.f32.gmra.mxu2 %vm658_vm1, %v560_v63 }
 0x134   : > { %1063 = vmatmul.msk.f32.gmra.mxu3 %vm658_vm1, %v560_v63 }
 0x13b   : > { %1048 = vmatmul.msk.f32.gmra.mxu2 %vm658_vm1, %v561_v0 }
 0x13c   : > { %1064 = vmatmul.msk.f32.gmra.mxu3 %vm658_vm1, %v561_v0 }
 0x160   : > { %v724_v11 = vpop.f32.mrf.mxu0 }
 0x161   : > { %v789_v12 = vpop.f32.mrf.mxu1  ;;  %v725_v18 = vadd.f32 %v724_v11, %v581_v4  ;;  %v636_v11 = vpop.permute.xlu1 %635 }
 0x162   : > { %v790_v20 = vadd.f32 %v789_v12, %v581_v4  ;;  %v843_v4 = vld [vmem:[%s1430_s28 + $0x30] sm:$0xff] }
 0x163   : > { %v853_v26 = vmul.f32 %v837_v19, %v725_v18 }
 0x164   : > { %v854_v29 = vmul.f32 %v838_v22, %v790_v20 }
 0x166   : > { %v1406_v1 = vpop.f32.mrf.mxu2 }
 0x167   : > { %v1408_v2 = vpop.f32.mrf.mxu3 }
 0x168   : > { %v727_v21 = vpop.f32.mrf.mxu0 }
 0x169   : > { %v792_v23 = vpop.f32.mrf.mxu1  ;;  %v728_v33 = vadd.f32 %v727_v21, %v586_v9 }
 0x16a   : > { %v793_v36 = vadd.f32 %v792_v23, %v586_v9  ;;  %v844_v9 = vld [vmem:[%s1430_s28 + $0x38] sm:$0xff] }
 0x16b   : > { %v855_v41 = vmul.f32 %v839_v35, %v728_v33 }
 0x16c   : > { %v856_v45 = vmul.f32 %v840_v38, %v793_v36  ;;  %v848_v38 = vld [vmem:[%s1430_s28 + $0x58] sm:$0xff] }
 0x16e   : > { %v1410_v3 = vpop.f32.mrf.mxu2 }
 0x16f   : > { %v1412_v5 = vpop.f32.mrf.mxu3 }
 0x170   : > { %v730_v39 = vpop.f32.mrf.mxu0 }
 0x171   : > { %v795_v42 = vpop.f32.mrf.mxu1  ;;  %v731_v49 = vadd.f32 %v730_v39, %v591_v6  ;;  %v646_v39 = vpop.permute.xlu0 %645 }
 0x172   : > { %v796_v51 = vadd.f32 %v795_v42, %v591_v6 }
 0x173   : > { %v857_v55 = vmul.f32 %v841_v50, %v731_v49  ;;  %v651_v49 = vpop.permute.xlu1 %650 }
 0x174   : > { %v858_v58 = vmul.f32 %v842_v52, %v796_v51 }
 0x176   : > { %v1414_v7 = vpop.f32.mrf.mxu2 }
 0x177   : > { %v1416_v8 = vpop.f32.mrf.mxu3 }
 0x178   : > { %v733_v59 = vpop.f32.mrf.mxu0 }
 0x179   : > { %v798_v61 = vpop.f32.mrf.mxu1  ;;  %v734_v0 = vadd.f32 %v733_v59, %v1418_v10 }
 0x17a   : > { %v799_v6 = vadd.f32 %v798_v61, %v1418_v10  ;;  %v845_v10 = vld [vmem:[%s1430_s28 + $0x40] sm:$0xff] }
 0x17b   : > { %v859_v18 = vmul.f32 %v843_v4, %v734_v0 }
 0x17c   : > { %v860_v21 = vmul.f32 %v844_v9, %v799_v6 }
 0x17e   : > { %v1423_v14 = vpop.f32.mrf.mxu2 }
 0x17f   : > { %v1425_v15 = vpop.f32.mrf.mxu3 }
 0x186   : > { %v748_v25 = vpop.f32.mrf.mxu2 }
 0x187   : > { %v749_v27 = vadd.f32 %v748_v25, %v621_v24  ;;  %v813_v28 = vpop.f32.mrf.mxu3  ;;  %v737_v25 = vadd.f32 %v1406_v1, %v1432_v16 }
 0x188   : > { %v814_v30 = vadd.f32 %v813_v28, %v621_v24  ;;  %v641_v28 = vpop.permute.xlu2 %640 }
 0x189   : > { %v869_v31 = vadd.f32 %v853_v26, %v749_v27  ;;  %v802_v26 = vadd.f32 %v1408_v2, %v1432_v16  ;;  %v846_v27 = vld [vmem:[%s1430_s28 + $0x48] sm:$0xff]  ;;  %v847_v2 = vld [vmem:[%s1430_s28 + $0x50] sm:$0xff]  ;;  %v805_v16 = vadd.f32 %v1412_v5, %v1420_v13  ;;  %v849_v5 = vld [vmem:[%s1430_s28 + $0x60] sm:$0xff] }
 0x18a   : > { %v870_v32 = vadd.f32 %v854_v29, %v814_v30  ;;  %v861_v30 = vmul.f32 %v845_v10, %v737_v25 }
 0x18b   : > { %885 = vst [vmem:[%s1441_s30] sm:$0xff] %v869_v31  ;;  %v862_v33 = vmul.f32 %v846_v27, %v802_v26 }
 0x18c   : > { %886 = vst [vmem:[%s1441_s30 + $0x8] sm:$0xff] %v870_v32 }
 0x18e   : > { %v751_v40 = vpop.f32.mrf.mxu2 }
 0x18f   : > { %v752_v43 = vadd.f32 %v751_v40, %v626_v37  ;;  %v816_v44 = vpop.f32.mrf.mxu3 }
 0x190   : > { %v817_v46 = vadd.f32 %v816_v44, %v626_v37  ;;  %v740_v37 = vadd.f32 %v1410_v3, %v1420_v13  ;;  %v864_v44 = vmul.f32 %v848_v38, %v805_v16  ;;  %v808_v13 = vadd.f32 %v1416_v8, %v1434_v17  ;;  %v851_v8 = vld [vmem:[%s1430_s28 + $0x70] sm:$0xff]  ;;  %v656_v59 = vpop.permute.xlu2 %655 }
 0x191   : > { %v871_v47 = vadd.f32 %v855_v41, %v752_v43 }
 0x192   : > { %v872_v48 = vadd.f32 %v856_v45, %v817_v46  ;;  %v863_v41 = vmul.f32 %v847_v2, %v740_v37 }
 0x193   : > { %887 = vst [vmem:[%s1441_s30 + $0x10] sm:$0xff] %v871_v47  ;;  %v743_v47 = vadd.f32 %v1414_v7, %v1434_v17  ;;  %v811_v17 = vadd.f32 %v1425_v15, %v1444_v34 }
 0x194   : > { %888 = vst [vmem:[%s1441_s30 + $0x18] sm:$0xff] %v872_v48  ;;  %v850_v48 = vld [vmem:[%s1430_s28 + $0x68] sm:$0xff] }
 0x195   : > { %v865_v51 = vmul.f32 %v849_v5, %v743_v47 }
 0x196   : > { %v754_v54 = vpop.f32.mrf.mxu2 }
 0x197   : > { %v755_v56 = vadd.f32 %v754_v54, %v631_v53  ;;  %v819_v57 = vpop.f32.mrf.mxu3  ;;  %v866_v54 = vmul.f32 %v850_v48, %v808_v13 }
 0x198   : > { %v820_v60 = vadd.f32 %v819_v57, %v631_v53  ;;  %v746_v57 = vadd.f32 %v1423_v14, %v1444_v34 }
 0x199   : > { %v873_v62 = vadd.f32 %v857_v55, %v755_v56 }
 0x19a   : > { %v874_v63 = vadd.f32 %v858_v58, %v820_v60  ;;  %v852_v58 = vld [vmem:[%s1430_s28 + $0x78] sm:$0xff]  ;;  %v867_v61 = vmul.f32 %v851_v8, %v746_v57 }
 0x19b   : > { %889 = vst [vmem:[%s1441_s30 + $0x20] sm:$0xff] %v873_v62  ;;  %v868_v0 = vmul.f32 %v852_v58, %v811_v17 }
 0x19c   : > { %890 = vst [vmem:[%s1441_s30 + $0x28] sm:$0xff] %v874_v63 }
 0x19e   : > { %v757_v12 = vpop.f32.mrf.mxu2 }
 0x19f   : > { %v758_v19 = vadd.f32 %v757_v12, %v636_v11  ;;  %v822_v20 = vpop.f32.mrf.mxu3 }
 0x1a0   : > { %v823_v22 = vadd.f32 %v822_v20, %v636_v11 }
 0x1a1   : > { %v875_v23 = vadd.f32 %v859_v18, %v758_v19 }
 0x1a2   : > { %v876_v24 = vadd.f32 %v860_v21, %v823_v22 }
 0x1a3   : > { %891 = vst [vmem:[%s1441_s30 + $0x30] sm:$0xff] %v875_v23 }
 0x1a4   : > { %892 = vst [vmem:[%s1441_s30 + $0x38] sm:$0xff] %v876_v24 }
 0x1a6   : > { %v760_v29 = vpop.f32.mrf.mxu2 }
 0x1a7   : > { %v761_v31 = vadd.f32 %v760_v29, %v641_v28  ;;  %v825_v32 = vpop.f32.mrf.mxu3 }
 0x1a8   : > { %v826_v35 = vadd.f32 %v825_v32, %v641_v28 }
 0x1a9   : > { %v877_v36 = vadd.f32 %v861_v30, %v761_v31 }
 0x1aa   : > { %v878_v1 = vadd.f32 %v862_v33, %v826_v35 }
 0x1ab   : > { %893 = vst [vmem:[%s1441_s30 + $0x40] sm:$0xff] %v877_v36 }
 0x1ac   : > { %894 = vst [vmem:[%s1441_s30 + $0x48] sm:$0xff] %v878_v1 }
 0x1ae   : > { %v763_v40 = vpop.f32.mrf.mxu2 }
 0x1af   : > { %v764_v42 = vadd.f32 %v763_v40, %v646_v39  ;;  %v828_v43 = vpop.f32.mrf.mxu3 }
 0x1b0   : > { %v829_v45 = vadd.f32 %v828_v43, %v646_v39 }
 0x1b1   : > { %v879_v46 = vadd.f32 %v863_v41, %v764_v42 }
 0x1b2   : > { %v880_v3 = vadd.f32 %v864_v44, %v829_v45 }
 0x1b3   : > { %895 = vst [vmem:[%s1441_s30 + $0x50] sm:$0xff] %v879_v46 }
 0x1b4   : > { %896 = vst [vmem:[%s1441_s30 + $0x58] sm:$0xff] %v880_v3 }
 0x1b6   : > { %v766_v50 = vpop.f32.mrf.mxu2 }
 0x1b7   : > { %v767_v52 = vadd.f32 %v766_v50, %v651_v49  ;;  %v831_v53 = vpop.f32.mrf.mxu3 }
 0x1b8   : > { %v832_v55 = vadd.f32 %v831_v53, %v651_v49 }
 0x1b9   : > { %v881_v56 = vadd.f32 %v865_v51, %v767_v52 }
 0x1ba   : > { %v882_v7 = vadd.f32 %v866_v54, %v832_v55 }
 0x1bb   : > { %897 = vst [vmem:[%s1441_s30 + $0x60] sm:$0xff] %v881_v56 }
 0x1bc   : > { %898 = vst [vmem:[%s1441_s30 + $0x68] sm:$0xff] %v882_v7 }
 0x1be   : > { %v769_v60 = vpop.f32.mrf.mxu2 }
 0x1bf   : > { %v770_v62 = vadd.f32 %v769_v60, %v656_v59  ;;  %v834_v63 = vpop.f32.mrf.mxu3 }
 0x1c0   : > { %v835_v4 = vadd.f32 %v834_v63, %v656_v59 }
 0x1c1   : > { %v883_v6 = vadd.f32 %v867_v61, %v770_v62 }
 0x1c2   : > { %v884_v9 = vadd.f32 %v868_v0, %v835_v4 }
 0x1c3   : > { %899 = vst [vmem:[%s1441_s30 + $0x70] sm:$0xff] %v883_v6 }
 0x1c4   : > { %900 = vst [vmem:[%s1441_s30 + $0x78] sm:$0xff] %v884_v9 }
 0x1c5 PF: > { %s16_s23 = sadd.s32 1, %s1136_s23   ;;  %s1509_s21 = smov %s1132_s22 }
 0x1c6   : > { %p13_p5 = scmp.ge.s32.totalorder %s16_s23, 4   ;;  %s1510_s22 = smov %s1512_s24 }
 0x1c8   :  { %15 = sbr.rel (!%p13_p5) target bundleno = 2 (0x2), region = 77 }

</bundles_post_ra>
